<compile_context>
chip_gen: v5e
topology: v5e:2x2
jax: 0.10.0
libtpu: 0.0.40
codegen_flags: <defaults>
</compile_context>

<pallas_src>
import jax
import jax.numpy as jnp
from jax.experimental import pallas as pl
from jax.experimental.pallas import tpu as pltpu


def _gate_mask_kernel(x_ref, wt_ref, o0_ref, o1_ref):
    x = x_ref[...]                                     # (tm, D), native dtype
    wt = wt_ref[...]                                   # (D, 2),  native dtype
    # Canonical MXU matmul: the big x tile is the LHS in its natural layout,
    # so no large transpose is ever inserted.  f32 accumulation.
    logits = jnp.dot(x, wt, preferred_element_type=jnp.float32)   # (tm, 2) f32
    l0 = logits[:, 0:1]                                # (tm, 1)
    l1 = logits[:, 1:2]                                # (tm, 1)
    # argmax(softmax(l)) == argmax(l); ties -> index 0 (torch.max convention).
    m0 = l0 >= l1                                      # (tm, 1) bool
    o0_ref[...] = m0.astype(o0_ref.dtype)
    o1_ref[...] = jnp.logical_not(m0).astype(o1_ref.dtype)


def _vmem_budget():
    """(per_input_buffer_bytes, vmem_limit_bytes), gated on physical VMEM."""
    cap = 64 * 1024 * 1024                 # conservative default == v7x per-TC VMEM
    try:
        info = pltpu.get_tpu_info()
        cap = int(getattr(info, "vmem_capacity_bytes", cap) or cap)
    except Exception:
        pass
    if cap >= 100 * 1024 * 1024:           # v5e / v6e: 128 MiB physical VMEM
        return 24 * 1024 * 1024, 80 * 1024 * 1024
    return 16 * 1024 * 1024, 48 * 1024 * 1024   # v7x: 64 MiB per TensorCore


def _pick_tm(M, D, itemsize, per_buf_bytes):
    """Row-tile size targeting ~per_buf_bytes per (double-buffered) x tile."""
    row_bytes = D * max(1, itemsize)
    tm = max(8, per_buf_bytes // row_bytes)
    if tm >= 128:
        tm = (tm // 128) * 128             # nicer DMA / store granularity
    else:
        tm = (tm // 8) * 8                 # huge-D fallback: sublane-aligned only
    if M <= tm:
        return M                           # single full-array block is legal
    return tm


def mutually_exclusive_gated_attention_mask(x, gate_weight, *, tm=None):
    """x: (B, S, D); gate_weight: (2, D) as in nn.Linear(d_model, 2, bias=False).
    Returns (mask0, mask1), each (B, S); mask0 + mask1 == 1 exactly."""
    B, S, D = x.shape
    M = B * S
    x2 = x.reshape(M, D)
    # Pre-transpose the tiny gate weight in the wrapper: (2, D) -> (D, 2).
    wt = jnp.asarray(gate_weight).T.astype(x.dtype)

    per_buf, vmem_limit = _vmem_budget()
    if tm is None:
        tm = _pick_tm(M, D, x2.dtype.itemsize, per_buf)
    grid = pl.cdiv(M, tm)                  # no input padding; partial block masked

    itemsize = x2.dtype.itemsize
    cost = pl.CostEstimate(
        flops=2 * M * D * 2,
        transcendentals=0,
        bytes_accessed=M * D * itemsize + D * 2 * itemsize + 2 * M * itemsize,
    )

    out0, out1 = pl.pallas_call(
        _gate_mask_kernel,
        out_shape=(
            jax.ShapeDtypeStruct((M, 1), x.dtype),
            jax.ShapeDtypeStruct((M, 1), x.dtype),
        ),
        grid_spec=pltpu.PrefetchScalarGridSpec(
            num_scalar_prefetch=0,
            grid=(grid,),
            in_specs=[
                pl.BlockSpec((tm, D), lambda i: (i, 0)),   # streamed rows of x
                pl.BlockSpec((D, 2), lambda i: (0, 0)),    # resident gate weight
            ],
            out_specs=[
                pl.BlockSpec((tm, 1), lambda i: (i, 0)),
                pl.BlockSpec((tm, 1), lambda i: (i, 0)),
            ],
        ),
        compiler_params=pltpu.CompilerParams(
            # Single streaming axis; marked parallel so v7x can shard the grid
            # across both TensorCores (no-op on single-TC v5e/v6e).
            dimension_semantics=("parallel",),
            vmem_limit_bytes=vmem_limit,
        ),
        cost_estimate=cost,
    )(x2, wt)

    # unbind(-1) for free: each output is already a contiguous (M, 1) slab.
    return out0.reshape(B, S), out1.reshape(B, S)


def _reference(x, gate_weight):
    logits = jnp.einsum("bsd,cd->bsc", x, gate_weight)
    y_soft = jax.nn.softmax(logits, axis=-1)
    idx = jnp.argmax(y_soft, axis=-1)
    y_hard = jax.nn.one_hot(idx, 2, dtype=x.dtype)
    return y_hard[..., 0], y_hard[..., 1]


if __name__ == "__main__":
    B, S, D = 2, 8, 32     # batch=2, seq=8, d_model=32
    key = jax.random.PRNGKey(0)
    kx, kw = jax.random.split(key)

    x = jax.random.normal(kx, (B, S, D), dtype=jnp.float32)
    # nn.Linear default init: U(-1/sqrt(D), 1/sqrt(D)); weight shape (2, D)
    bound = 1.0 / (D ** 0.5)
    gate_weight = jax.random.uniform(kw, (2, D), dtype=jnp.float32,
                                     minval=-bound, maxval=bound)

    m0, m1 = mutually_exclusive_gated_attention_mask(x, gate_weight)
    jax.block_until_ready((m0, m1))

    r0, r1 = _reference(x, gate_weight)
    assert m0.shape == (B, S) and m1.shape == (B, S)
    assert jnp.allclose(m0, r0, atol=1e-5), "mask0 mismatch vs reference"
    assert jnp.allclose(m1, r1, atol=1e-5), "mask1 mismatch vs reference"
    # exactly mutually exclusive (hard one-hot written directly)
    assert jnp.array_equal(m0 + m1, jnp.ones_like(m0))

    print("KERNEL_OK")
</pallas_src>

<mosaic_0001>
module attributes {stable_mosaic.version = 11 : i64} {
  func.func @_gate_mask_kernel(%arg0: i32, %arg1: memref<16x32xf32, #tpu.memory_space<vmem>>, %arg2: memref<32x2xf32, #tpu.memory_space<vmem>>, %arg3: memref<16x1xf32, #tpu.memory_space<vmem>>, %arg4: memref<16x1xf32, #tpu.memory_space<vmem>>) attributes {dimension_semantics = [#tpu.dimension_semantics<parallel>], iteration_bounds = array<i64: 1>, scalar_prefetch = 0 : i64, scratch_operands = 0 : i64, tpu.core_type = #tpu.core_type<tc>, window_params = [{transform_indices = @transform_0, window_bounds = array<i64: 16, 32>}, {pipeline_mode = #tpu.pipeline_mode<synchronous>, transform_indices = @transform_1, window_bounds = array<i64: 32, 2>}, {transform_indices = @transform_2, window_bounds = array<i64: 16, 1>}, {transform_indices = @transform_3, window_bounds = array<i64: 16, 1>}]} {
    %c0 = arith.constant 0 : index
    %c0_0 = arith.constant 0 : index
    %0 = vector.load %arg1[%c0, %c0_0] : memref<16x32xf32, #tpu.memory_space<vmem>>, vector<16x32xf32>
    %c0_1 = arith.constant 0 : index
    %c0_2 = arith.constant 0 : index
    %1 = vector.load %arg2[%c0_1, %c0_2] : memref<32x2xf32, #tpu.memory_space<vmem>>, vector<32x2xf32>
    %cst = arith.constant dense<0.000000e+00> : vector<16x2xf32>
    %2 = tpu.matmul %0, %1, %cst {dimension_numbers = #tpu.dot_dimension_numbers<[1], [0], [0], [1], [0, 0, 1, 1], [], []>} : vector<16x32xf32>, vector<32x2xf32>, vector<16x2xf32> -> vector<16x2xf32>
    %3 = vector.extract_strided_slice %2 {offsets = [0, 0], sizes = [16, 1], strides = [1, 1]} : vector<16x2xf32> to vector<16x1xf32>
    %4 = vector.extract_strided_slice %2 {offsets = [0, 1], sizes = [16, 1], strides = [1, 1]} : vector<16x2xf32> to vector<16x1xf32>
    %5 = arith.cmpf oge, %3, %4 : vector<16x1xf32>
    %6 = arith.extui %5 : vector<16x1xi1> to vector<16x1xi32>
    %7 = arith.sitofp %6 : vector<16x1xi32> to vector<16x1xf32>
    %c0_3 = arith.constant 0 : index
    %c0_4 = arith.constant 0 : index
    %8 = vector.load %arg3[%c0_3, %c0_4] : memref<16x1xf32, #tpu.memory_space<vmem>>, vector<16x1xf32>
    tpu.vector_store %arg3[%c0_3, %c0_4], %7 {strides = array<i32>} : memref<16x1xf32, #tpu.memory_space<vmem>>, vector<16x1xf32>,
    %cst_5 = arith.constant dense<true> : vector<16x1xi1>
    %9 = arith.xori %5, %cst_5 : vector<16x1xi1>
    %10 = arith.extui %9 : vector<16x1xi1> to vector<16x1xi32>
    %11 = arith.sitofp %10 : vector<16x1xi32> to vector<16x1xf32>
    %c0_6 = arith.constant 0 : index
    %c0_7 = arith.constant 0 : index
    %12 = vector.load %arg4[%c0_6, %c0_7] : memref<16x1xf32, #tpu.memory_space<vmem>>, vector<16x1xf32>
    tpu.vector_store %arg4[%c0_6, %c0_7], %11 {strides = array<i32>} : memref<16x1xf32, #tpu.memory_space<vmem>>, vector<16x1xf32>,
    return
  }
  func.func @transform_0(%arg0: i32) -> (i32, i32) {
    %c0_i32 = arith.constant 0 : i32
    %c0_i32_0 = arith.constant 0 : i32
    return %arg0, %c0_i32 : i32, i32
  }
  func.func @transform_1(%arg0: i32) -> (i32, i32) {
    %c0_i32 = arith.constant 0 : i32
    %c0_i32_0 = arith.constant 0 : i32
    %c0_i32_1 = arith.constant 0 : i32
    return %c0_i32, %c0_i32_0 : i32, i32
  }
  func.func @transform_2(%arg0: i32) -> (i32, i32) {
    %c0_i32 = arith.constant 0 : i32
    %c0_i32_0 = arith.constant 0 : i32
    return %arg0, %c0_i32 : i32, i32
  }
  func.func @transform_3(%arg0: i32) -> (i32, i32) {
    %c0_i32 = arith.constant 0 : i32
    %c0_i32_0 = arith.constant 0 : i32
    return %arg0, %c0_i32 : i32, i32
  }
}

</mosaic_0001>

<bundles_post_ra>
// kernel: tpu_custom_call.1
= control target key start
LH: loop header
LB: loop body
LE: loop exit
PB: predicated region body
PF: predicated region fallthrough
CT: control target
= control target key end

     0   :  { %vm19_vm0 = vcmask 261120   ;;  %s95_s24 = smov 127   ;;  %vm63_vm1 = vcmask 7168   ;;  %v96_v9 = vmov 0.0   ;;  %vm97_vm3 = vmmov 1   ;;  %s152_s1 = inlined_call_operand.vmem [shape: f32[32,2], index: 1, kind: input, shape index: {}]   ;;  %s153_s0 = inlined_call_operand.vmem [shape: f32[16,32], index: 0, kind: input, shape index: {}]   ;;  %s154_s2 = inlined_call_operand.vmem [shape: f32[16,1], index: 2, kind: output, shape index: {0}]   ;;  %s155_s3 = inlined_call_operand.vmem [shape: f32[16,1], index: 3, kind: output, shape index: {1}]  }
   0x1   :  { %v18_v0 = vld [vmem:[%s152_s1 + $0x18] sm:$0xff]  ;;  %v17_v1 = vld [vmem:[%s152_s1 + $0x10] sm:$0xff]  ;;  %v16_v2 = vld [vmem:[%s152_s1 + $0x8] sm:$0xff] }
   0x2   :  { %38 = vmatpush.msra.mxu0 %v18_v0  ;;  %88 = vmatpush.msra.mxu1 %v18_v0  ;;  %v15_v3 = vld [vmem:[%s152_s1] sm:$0xff]  ;;  %v14_v5 = vld [vmem:[%s153_s0 + $0x8] sm:$0xff] }
   0x3   :  { %v13_v4 = vld [vmem:[%s153_s0] sm:$0xff] }
   0x4   :  { %39 = vmatpush.msra.mxu0 %v17_v1  ;;  %89 = vmatpush.msra.mxu1 %v17_v1 }
   0x6   :  { %40 = vmatpush.msra.mxu0 %v16_v2  ;;  %90 = vmatpush.msra.mxu1 %v16_v2 }
   0x8   :  { %41 = vmatpush.msra.mxu0 %v15_v3  ;;  %91 = vmatpush.msra.mxu1 %v15_v3 }
   0x9   :  { %82 = vmatmul.msk.f32.vlgmr.msra.gmra.mxu0 %vm19_vm0, %v13_v4  ;;  %83 = vmatmul.msk.f32.vlgmr.msra.gmra.mxu1 %vm19_vm0, %v14_v5 }
  0x86   :  { %v43_v6 = vpop.f32.mrf.mxu0  ;;  %v46_v7 = vpop.f32.mrf.mxu1 }
  0x87   :  { %51 = vrot.lane.b32.xlu0 %v43_v6, %s95_s24 }
  0x8f   :  { %53 = vrot.lane.b32.xlu0 %v46_v7, %s95_s24 }
  0xf9   :  { %v52_v8 = vpop.permute.xlu0 %51 }
  0xfa   :  { %vm57_vm2 = vcmp.ge.f32.partialorder %v43_v6, %v52_v8 }
  0xfb   :  { %v84_v10 = vsel %vm57_vm2, 1.0, %v96_v9  ;;  %vm66_vm4 = vmxor %vm57_vm2, %vm97_vm3 }
  0xfc   :  { %64 = vst.msk [vmem:[%s154_s2] sm:$0xff] %vm63_vm1, %v84_v10  ;;  %v86_v11 = vsel %vm66_vm4, 1.0, %v96_v9 }
  0xfd   :  { %72 = vst.msk [vmem:[%s155_s3] sm:$0xff] %vm63_vm1, %v86_v11 }
 0x101   :  { %v54_v12 = vpop.permute.xlu0 %53 }
 0x102   :  { %vm58_vm5 = vcmp.ge.f32.partialorder %v46_v7, %v54_v12 }
 0x103   :  { %v85_v13 = vsel %vm58_vm5, 1.0, %v96_v9  ;;  %vm67_vm6 = vmxor %vm58_vm5, %vm97_vm3 }
 0x104   :  { %65 = vst.msk [vmem:[%s154_s2 + $0x8] sm:$0xff] %vm63_vm1, %v85_v13  ;;  %v87_v14 = vsel %vm67_vm6, 1.0, %v96_v9 }
 0x105   :  { %73 = vst.msk [vmem:[%s155_s3 + $0x8] sm:$0xff] %vm63_vm1, %v87_v14 }

</bundles_post_ra>
